<compile_context>
chip_gen: v7x
topology: tpu7x:2x2x1
jax: 0.10.0
libtpu: 0.0.40
codegen_flags: <defaults>
</compile_context>

<pallas_src>
import functools
import math

import jax
import jax.numpy as jnp
from jax.experimental import pallas as pl
from jax.experimental.pallas import tpu as pltpu


def _patch_merge_kernel(x_ref, we_ref, wo_ref, bias_ref, out_ref, *, eps):
    """One grid step: TR row-pairs -> TR*W2 merged + normalized + projected tokens.

    x_ref:    (TR, 2, W2, 2C)  row-pair tile; dim 1 = image-row parity, last dim
                               packs the column pair [even col C | odd col C].
    we_ref:   (2C, Cout)       gamma-folded weight for even-row channels [x0|x2]
    wo_ref:   (2C, Cout)       gamma-folded weight for odd-row channels  [x1|x3]
    bias_ref: (1, Cout)        beta @ W^T  (f32)
    out_ref:  (TR*W2, Cout)
    """
    tr, _, w2, c2 = x_ref.shape
    m = tr * w2
    inv_c4 = 1.0 / (2 * c2)

    x = x_ref[...]
    # TODO(synk): for W2 % 8 != 0 (real Swin stages: W2 in {28, 14, 7}) this
    # flatten is a sublane repack rather than a free view; keep the block 3-D
    # (rank-3 dot_general) there if the bundle dump shows relayout copies.
    e = x[:, 0].reshape(m, c2).astype(jnp.float32)   # [x0 | x2]  (even image row)
    o = x[:, 1].reshape(m, c2).astype(jnp.float32)   # [x1 | x3]  (odd image row)

    # LayerNorm statistics over the merged 4C channels, in f32.
    mean = (jnp.sum(e, axis=-1, keepdims=True)
            + jnp.sum(o, axis=-1, keepdims=True)) * inv_c4
    ec = e - mean
    oc = o - mean
    var = (jnp.sum(ec * ec, axis=-1, keepdims=True)
           + jnp.sum(oc * oc, axis=-1, keepdims=True)) * inv_c4
    rstd = jax.lax.rsqrt(var + eps)

    # gamma/beta were folded into we/wo/bias on the host: only scale by rstd here.
    wdt = we_ref.dtype
    en = (ec * rstd).astype(wdt)
    on = (oc * rstd).astype(wdt)

    # Linear(4C -> 2C, bias=False) as two K=2C MXU matmuls with f32 accumulation.
    # TODO(synk): on v7x verify the second dot accumulates in the MRB; if the
    # bundle shows vpop+vadd, fuse into a single K=4C matmul instead.
    y = jnp.dot(en, we_ref[...], preferred_element_type=jnp.float32)
    y = y + jnp.dot(on, wo_ref[...], preferred_element_type=jnp.float32)
    y = y + bias_ref[...]
    out_ref[...] = y.astype(out_ref.dtype)


def prepare_patch_merging_params(gamma, beta, weight, *, compute_dtype=jnp.bfloat16):
    """One-time host-side parameter prep (keep OUT of the per-forward path).

    PyTorch:  y = LayerNorm(x4) @ W.T  with x4 channel order [x0, x1, x2, x3].
    Fold gamma into the weight and beta into an output-space bias:
        y = ((x4 - mean) * rstd) @ (diag(gamma) @ W.T) + beta @ W.T
    then split/permute to the kernel order: even image row -> [x0|x2], odd image
    row -> [x1|x3].  Weight is pre-transposed to (in, out) and cast to the MXU
    compute dtype (default bf16); the bias stays f32.
    """
    c4 = gamma.shape[-1]
    c = c4 // 4
    g = gamma.reshape(-1).astype(jnp.float32)
    b = beta.reshape(-1).astype(jnp.float32)
    w_t = weight.astype(jnp.float32).T                     # (4C, 2C_out)
    w_s = w_t * g[:, None]                                 # gamma folded in
    bias = (b @ w_t).reshape(1, -1)                        # (1, 2C_out), f32
    w_e = jnp.concatenate([w_s[:c], w_s[2 * c:3 * c]], axis=0).astype(compute_dtype)
    w_o = jnp.concatenate([w_s[c:2 * c], w_s[3 * c:]], axis=0).astype(compute_dtype)
    return w_e, w_o, bias


def _tpu_vmem_capacity_bytes():
    try:
        info = pltpu.get_tpu_info()
        return int(getattr(info, "vmem_capacity_bytes", 64 << 20))
    except Exception:
        return 64 << 20            # conservative (v7x-class) fallback


def _divisors(n):
    out = []
    for d in range(1, int(math.isqrt(n)) + 1):
        if n % d == 0:
            out.append(d)
            if d != n // d:
                out.append(n // d)
    return sorted(out)


def _param_spec(shape):
    """Grid-invariant operand: constant index_map, single-buffered if supported."""
    index_map = lambda i: (0,) * len(shape)
    buffered = getattr(pl, "Buffered", None)
    if buffered is not None:
        try:
            return pl.BlockSpec(shape, index_map, pipeline_mode=buffered(1))
        except TypeError:          # pipeline_mode kwarg unsupported in this jax
            pass
    return pl.BlockSpec(shape, index_map)


def patch_merging_pallas(x, input_resolution, params, *, eps=1e-5,
                         tokens_per_tile=None, vmem_block_budget=None):
    """x: (B, H*W, C); params from prepare_patch_merging_params.
    Returns (B, H/2*W/2, 2C_out), matching PyTorch PatchMerging.forward."""
    H, W = input_resolution
    B, L, C = x.shape
    assert L == H * W, "input feature has wrong size"
    assert H % 2 == 0 and W % 2 == 0, f"x size ({H}*{W}) are not even."
    w_e, w_o, bias = params

    H2, W2 = H // 2, W // 2
    c2 = 2 * C
    out_dim = w_e.shape[-1]
    n_rows = B * H2                    # row-pairs; each yields W2 output tokens
    n_tokens = n_rows * W2

    # ---- device-class dependent defaults (64 MiB v7x-class vs 128 MiB parts) ---
    vmem_cap = _tpu_vmem_capacity_bytes()
    small_vmem = vmem_cap <= (64 << 20)
    num_tc = 2 if small_vmem else 1          # v7x: 2 TensorCores per chip
    if tokens_per_tile is None:
        tokens_per_tile = 1024 if small_vmem else 4096
    if vmem_block_budget is None:
        vmem_block_budget = (9 << 20) if small_vmem else (28 << 20)

    # Free (contiguous) reshape: (B, H*W, C) -> (B*H2, 2, W2, 2C).
    x_r = x.reshape(n_rows, 2, W2, c2)

    # ---- row-pair tile TR: token target, VMEM budget incl. padding + f32 temps --
    itemsize = jnp.dtype(x.dtype).itemsize
    w_itemsize = jnp.dtype(w_e.dtype).itemsize
    c2_pad = -(-c2 // 128) * 128
    out_pad = -(-out_dim // 128) * 128
    per_token = (2 * (2 * c2_pad) * itemsize      # double-buffered input block
                 + 2 * out_pad * itemsize         # double-buffered output block
                 + 3 * (2 * c2_pad) * 4)          # in-kernel f32 temporaries
    rows_cap = max(1, vmem_block_budget // (per_token * W2))
    rows_target = max(1, min(n_rows, rows_cap, max(1, tokens_per_tile // W2)))

    def _block_ok(r):                  # output block (r*W2, out) sublane rule
        return (r * W2) % 8 == 0 or r == n_rows

    cands = [d for d in _divisors(n_rows) if _block_ok(d) and d <= rows_target]
    if num_tc > 1 and cands:           # prefer an even number of grid steps
        even = [d for d in cands if (n_rows // d) % num_tc == 0]
        if even:
            cands = even
    if cands:
        tr = max(cands)                # exact divisor: no ragged last step
    else:                              # fallback: step-aligned, masked last step
        step = 8 // math.gcd(W2, 8)
        tr = min(n_rows, max(step, (rows_target // step) * step))
    grid = (pl.cdiv(n_rows, tr),)

    # ---- VMEM limit with headroom (never request the full physical capacity) --
    blk_in = tr * W2 * 2 * c2_pad * itemsize
    blk_out = tr * W2 * out_pad * itemsize
    f32_tmp = 3 * tr * W2 * 2 * c2_pad * 4
    w_bytes = 2 * (-(-c2 // 8) * 8) * out_pad * w_itemsize     # single-buffered
    b_bytes = 8 * out_pad * 4
    need = 2 * blk_in + 2 * blk_out + f32_tmp + w_bytes + b_bytes
    hard_cap = max(32 << 20, min(vmem_cap - (12 << 20), int(0.8 * vmem_cap)))
    vmem_limit = int(min(hard_cap, max(32 << 20, 2 * need)))

    cost = pl.CostEstimate(
        flops=2 * n_tokens * (2 * c2) * out_dim,
        transcendentals=n_tokens,
        bytes_accessed=(n_tokens * 2 * c2 * itemsize
                        + n_tokens * out_dim * itemsize
                        + w_bytes + b_bytes))

    grid_spec = pltpu.PrefetchScalarGridSpec(
        num_scalar_prefetch=0,
        grid=grid,
        in_specs=[
            pl.BlockSpec((tr, 2, W2, c2), lambda i: (i, 0, 0, 0)),  # activations
            _param_spec((c2, out_dim)),                             # w_e
            _param_spec((c2, out_dim)),                             # w_o
            _param_spec((1, out_dim)),                              # bias
        ],
        out_specs=pl.BlockSpec((tr * W2, out_dim), lambda i: (i, 0)),
    )

    out = pl.pallas_call(
        functools.partial(_patch_merge_kernel, eps=eps),
        out_shape=jax.ShapeDtypeStruct((n_tokens, out_dim), x.dtype),
        grid_spec=grid_spec,
        compiler_params=pltpu.CompilerParams(
            dimension_semantics=("parallel",),
            vmem_limit_bytes=vmem_limit),
        cost_estimate=cost,
    )(x_r, w_e, w_o, bias)

    return out.reshape(B, H2 * W2, out_dim)          # free reshape


def patch_merging_ref(x, input_resolution, gamma, beta, weight, *, eps=1e-5):
    """Pure-JAX reference mirroring the PyTorch forward (original ordering)."""
    H, W = input_resolution
    B, L, C = x.shape
    xg = x.reshape(B, H, W, C)
    x0 = xg[:, 0::2, 0::2, :]
    x1 = xg[:, 1::2, 0::2, :]
    x2 = xg[:, 0::2, 1::2, :]
    x3 = xg[:, 1::2, 1::2, :]
    xm = jnp.concatenate([x0, x1, x2, x3], axis=-1).reshape(B, -1, 4 * C)
    xm = xm.astype(jnp.float32)
    mean = jnp.mean(xm, axis=-1, keepdims=True)
    var = jnp.mean((xm - mean) ** 2, axis=-1, keepdims=True)
    xn = (xm - mean) * jax.lax.rsqrt(var + eps) * gamma + beta
    return (xn @ weight.T.astype(jnp.float32)).astype(x.dtype)


if __name__ == "__main__":
    key = jax.random.PRNGKey(0)
    B, H, W, dim = 2, 16, 16, 4            # input_resolution=(16, 16), dim=4
    k1, k2, k3, k4 = jax.random.split(key, 4)

    x = jax.random.normal(k1, (B, H * W, dim), dtype=jnp.float32)
    weight = jax.random.normal(k2, (2 * dim, 4 * dim), dtype=jnp.float32) * 0.05
    gamma = 1.0 + 0.1 * jax.random.normal(k3, (4 * dim,), dtype=jnp.float32)
    beta = 0.1 * jax.random.normal(k4, (4 * dim,), dtype=jnp.float32)

    params = prepare_patch_merging_params(gamma, beta, weight,
                                          compute_dtype=jnp.bfloat16)
    out = patch_merging_pallas(x, (H, W), params)
    out = jax.block_until_ready(out)

    ref = patch_merging_ref(x, (H, W), gamma, beta, weight)
    assert out.shape == (B, (H // 2) * (W // 2), 2 * dim), out.shape
    err = float(jnp.max(jnp.abs(out.astype(jnp.float32) - ref.astype(jnp.float32))))
    # bf16 MXU operands (LN stats / accumulation stay f32) -> looser tolerance.
    assert err < 2e-2, err

    print("KERNEL_OK")
</pallas_src>

<mosaic_0001>
module attributes {stable_mosaic.version = 11 : i64} {
  func.func @_patch_merge_kernel(%arg0: i32, %arg1: memref<8x2x8x8xf32, #tpu.memory_space<vmem>>, %arg2: memref<8x8xbf16, #tpu.memory_space<vmem>>, %arg3: memref<8x8xbf16, #tpu.memory_space<vmem>>, %arg4: memref<1x8xf32, #tpu.memory_space<vmem>>, %arg5: memref<64x8xf32, #tpu.memory_space<vmem>>) attributes {dimension_semantics = [#tpu.dimension_semantics<parallel>], iteration_bounds = array<i64: 2>, scalar_prefetch = 0 : i64, scratch_operands = 0 : i64, tpu.core_type = #tpu.core_type<tc>, window_params = [{transform_indices = @transform_0, window_bounds = array<i64: 8, 2, 8, 8>}, {pipeline_mode = #tpu.pipeline_mode<synchronous>, transform_indices = @transform_1, window_bounds = array<i64: 8, 8>}, {pipeline_mode = #tpu.pipeline_mode<synchronous>, transform_indices = @transform_2, window_bounds = array<i64: 8, 8>}, {pipeline_mode = #tpu.pipeline_mode<synchronous>, transform_indices = @transform_3, window_bounds = array<i64: 1, 8>}, {transform_indices = @transform_4, window_bounds = array<i64: 64, 8>}]} {
    %c0 = arith.constant 0 : index
    %c0_0 = arith.constant 0 : index
    %c0_1 = arith.constant 0 : index
    %c0_2 = arith.constant 0 : index
    %0 = vector.load %arg1[%c0, %c0_0, %c0_1, %c0_2] : memref<8x2x8x8xf32, #tpu.memory_space<vmem>>, vector<8x2x8x8xf32>
    %1 = vector.extract_strided_slice %0 {offsets = [0, 0, 0, 0], sizes = [8, 1, 8, 8], strides = [1, 1, 1, 1]} : vector<8x2x8x8xf32> to vector<8x1x8x8xf32>
    %2 = vector.shape_cast %1 : vector<8x1x8x8xf32> to vector<8x8x8xf32>
    %3 = vector.shape_cast %2 : vector<8x8x8xf32> to vector<64x8xf32>
    %4 = vector.extract_strided_slice %0 {offsets = [0, 1, 0, 0], sizes = [8, 1, 8, 8], strides = [1, 1, 1, 1]} : vector<8x2x8x8xf32> to vector<8x1x8x8xf32>
    %5 = vector.shape_cast %4 : vector<8x1x8x8xf32> to vector<8x8x8xf32>
    %6 = vector.shape_cast %5 : vector<8x8x8xf32> to vector<64x8xf32>
    %cst = arith.constant dense<0.000000e+00> : vector<64xf32>
    %7 = vector.multi_reduction <add>, %3, %cst [1] : vector<64x8xf32> to vector<64xf32>
    %8 = vector.shape_cast %7 : vector<64xf32> to vector<64x1xf32>
    %cst_3 = arith.constant dense<0.000000e+00> : vector<64xf32>
    %9 = vector.multi_reduction <add>, %6, %cst_3 [1] : vector<64x8xf32> to vector<64xf32>
    %10 = vector.shape_cast %9 : vector<64xf32> to vector<64x1xf32>
    %11 = arith.addf %8, %10 : vector<64x1xf32>
    %cst_4 = arith.constant 6.250000e-02 : f32
    %12 = vector.broadcast %cst_4 : f32 to vector<64x1xf32>
    %13 = arith.mulf %11, %12 : vector<64x1xf32>
    %14 = vector.broadcast %13 : vector<64x1xf32> to vector<64x8xf32>
    %15 = arith.subf %3, %14 : vector<64x8xf32>
    %16 = vector.broadcast %13 : vector<64x1xf32> to vector<64x8xf32>
    %17 = arith.subf %6, %16 : vector<64x8xf32>
    %18 = arith.mulf %15, %15 : vector<64x8xf32>
    %cst_5 = arith.constant dense<0.000000e+00> : vector<64xf32>
    %19 = vector.multi_reduction <add>, %18, %cst_5 [1] : vector<64x8xf32> to vector<64xf32>
    %20 = vector.shape_cast %19 : vector<64xf32> to vector<64x1xf32>
    %21 = arith.mulf %17, %17 : vector<64x8xf32>
    %cst_6 = arith.constant dense<0.000000e+00> : vector<64xf32>
    %22 = vector.multi_reduction <add>, %21, %cst_6 [1] : vector<64x8xf32> to vector<64xf32>
    %23 = vector.shape_cast %22 : vector<64xf32> to vector<64x1xf32>
    %24 = arith.addf %20, %23 : vector<64x1xf32>
    %cst_7 = arith.constant 6.250000e-02 : f32
    %25 = vector.broadcast %cst_7 : f32 to vector<64x1xf32>
    %26 = arith.mulf %24, %25 : vector<64x1xf32>
    %cst_8 = arith.constant 9.99999974E-6 : f32
    %27 = vector.broadcast %cst_8 : f32 to vector<64x1xf32>
    %28 = arith.addf %26, %27 : vector<64x1xf32>
    %29 = math.rsqrt %28 : vector<64x1xf32>
    %30 = vector.broadcast %29 : vector<64x1xf32> to vector<64x8xf32>
    %31 = arith.mulf %15, %30 : vector<64x8xf32>
    %32 = arith.truncf %31 : vector<64x8xf32> to vector<64x8xbf16>
    %33 = vector.broadcast %29 : vector<64x1xf32> to vector<64x8xf32>
    %34 = arith.mulf %17, %33 : vector<64x8xf32>
    %35 = arith.truncf %34 : vector<64x8xf32> to vector<64x8xbf16>
    %c0_9 = arith.constant 0 : index
    %c0_10 = arith.constant 0 : index
    %36 = vector.load %arg2[%c0_9, %c0_10] : memref<8x8xbf16, #tpu.memory_space<vmem>>, vector<8x8xbf16>
    %cst_11 = arith.constant dense<0.000000e+00> : vector<64x8xf32>
    %37 = tpu.matmul %32, %36, %cst_11 {dimension_numbers = #tpu.dot_dimension_numbers<[1], [0], [0], [1], [0, 0, 1, 1], [], []>} : vector<64x8xbf16>, vector<8x8xbf16>, vector<64x8xf32> -> vector<64x8xf32>
    %c0_12 = arith.constant 0 : index
    %c0_13 = arith.constant 0 : index
    %38 = vector.load %arg3[%c0_12, %c0_13] : memref<8x8xbf16, #tpu.memory_space<vmem>>, vector<8x8xbf16>
    %cst_14 = arith.constant dense<0.000000e+00> : vector<64x8xf32>
    %39 = tpu.matmul %35, %38, %cst_14 {dimension_numbers = #tpu.dot_dimension_numbers<[1], [0], [0], [1], [0, 0, 1, 1], [], []>} : vector<64x8xbf16>, vector<8x8xbf16>, vector<64x8xf32> -> vector<64x8xf32>
    %40 = arith.addf %37, %39 : vector<64x8xf32>
    %c0_15 = arith.constant 0 : index
    %c0_16 = arith.constant 0 : index
    %41 = vector.load %arg4[%c0_15, %c0_16] : memref<1x8xf32, #tpu.memory_space<vmem>>, vector<1x8xf32>
    %42 = vector.broadcast %41 : vector<1x8xf32> to vector<64x8xf32>
    %43 = arith.addf %40, %42 : vector<64x8xf32>
    %c0_17 = arith.constant 0 : index
    %c0_18 = arith.constant 0 : index
    %44 = vector.load %arg5[%c0_17, %c0_18] : memref<64x8xf32, #tpu.memory_space<vmem>>, vector<64x8xf32>
    tpu.vector_store %arg5[%c0_17, %c0_18], %43 {strides = array<i32>} : memref<64x8xf32, #tpu.memory_space<vmem>>, vector<64x8xf32>,
    return
  }
  func.func @transform_0(%arg0: i32) -> (i32, i32, i32, i32) {
    %c0_i32 = arith.constant 0 : i32
    %c0_i32_0 = arith.constant 0 : i32
    %c0_i32_1 = arith.constant 0 : i32
    %c0_i32_2 = arith.constant 0 : i32
    return %arg0, %c0_i32, %c0_i32_0, %c0_i32_1 : i32, i32, i32, i32
  }
  func.func @transform_1(%arg0: i32) -> (i32, i32) {
    %c0_i32 = arith.constant 0 : i32
    %c0_i32_0 = arith.constant 0 : i32
    %c0_i32_1 = arith.constant 0 : i32
    return %c0_i32, %c0_i32_0 : i32, i32
  }
  func.func @transform_2(%arg0: i32) -> (i32, i32) {
    %c0_i32 = arith.constant 0 : i32
    %c0_i32_0 = arith.constant 0 : i32
    %c0_i32_1 = arith.constant 0 : i32
    return %c0_i32, %c0_i32_0 : i32, i32
  }
  func.func @transform_3(%arg0: i32) -> (i32, i32) {
    %c0_i32 = arith.constant 0 : i32
    %c0_i32_0 = arith.constant 0 : i32
    %c0_i32_1 = arith.constant 0 : i32
    return %c0_i32, %c0_i32_0 : i32, i32
  }
  func.func @transform_4(%arg0: i32) -> (i32, i32) {
    %c0_i32 = arith.constant 0 : i32
    %c0_i32_0 = arith.constant 0 : i32
    return %arg0, %c0_i32 : i32, i32
  }
}

</mosaic_0001>

<bundles_post_ra>
// kernel: tpu_custom_call.1
= control target key start
LH: loop header
LB: loop body
LE: loop exit
PB: predicated region body
PF: predicated region fallthrough
CT: control target
= control target key end

     0   :  { %s783_s15 = smov 0   ;;  %s1017_s0 = inlined_call_operand.vmem [shape: f32[16,2,8,8], index: 0, kind: input, shape index: {}]   ;;  %s1018_s1 = inlined_call_operand.vmem [shape: bf16[8,8], index: 1, kind: input, shape index: {}]   ;;  %s1019_s2 = inlined_call_operand.vmem [shape: bf16[8,8], index: 2, kind: input, shape index: {}]   ;;  %s1020_s3 = inlined_call_operand.vmem [shape: f32[1,8], index: 3, kind: input, shape index: {}]   ;;  %s1021_s4 = inlined_call_operand.vmem [shape: f32[128,8], index: 4, kind: output, shape index: {}]  }
   0x1 LB: > { %s664_s16 = sadd.s32 4294967295, %s756_s15   ;;  %p668_p0 = scmp.ge.s32.totalorder %s756_s15, 1  ;;  %s756_s15 = sphi %s783_s15, %s14_s15  }
   0x2   : > { %p164_p1 = scmp.lt.s32.totalorder %s756_s15, 3 }
   0x4   : > { %p165_p2 = pnand %p668_p0, %p164_p1 }
   0x5   : > { %s669_s17 = sshll.u32 (!%p165_p2), %s664_s16, 3  ;;  %vm221_vm0 = vcmask (!%p165_p2), 64512   ;;  %vm436_vm1 = vcmask (!%p165_p2), 1043456  }
   0x6   : > { %168 = sbr.rel (%p165_p2) target bundleno = 585 (0x249), region = 36  ;;  %p192_p3 = scmp.lt.s32.totalorder (!%p165_p2), %s669_s17, 15 }
   0xd   : > { %s1023_s17 = smov (!%p192_p3, %s669_s17), 15 }
   0xe   : > { %s685_s18 = sshll.u32 %s1023_s17, 4  ;;  %s673_s26 = sshll.u32 %s1023_s17, 3 }
   0xf   : > { %s797_s21 = scalar_lea.vmem %s1017_s0, %s685_s18  ;;  %s996_s5 = scalar_lea.vmem %s1021_s4, %s673_s26 }
  0x10   : > { %v206_v0 = vld [vmem:[%s797_s21 + $0x8] sm:$0xff]  ;;  %v205_v1 = vld [vmem:[%s797_s21] sm:$0xff]  ;;  %v208_v2 = vld [vmem:[%s797_s21 + $0x18] sm:$0xff] }
  0x11   : > { %v246_v3 = vsel %vm221_vm0, %v206_v0, 0.0  ;;  %v222_v4 = vsel %vm221_vm0, %v205_v1, 0.0  ;;  %v207_v5 = vld [vmem:[%s797_s21 + $0x10] sm:$0xff]  ;;  %v249_v6 = vsel %vm221_vm0, %v208_v2, 0.0  ;;  %v811_v9 = vld [vmem:[%s797_s21 + $0x20] sm:$0xff]  ;;  %v818_v12 = vld [vmem:[%s797_s21 + $0x38] sm:$0xff] }
  0x12   : > { %247 = vadd.xlane.f32.xlu1 %v246_v3  ;;  %223 = vadd.xlane.f32.xlu0 %v222_v4  ;;  %v225_v7 = vsel %vm221_vm0, %v207_v5, 0.0  ;;  %v808_v8 = vld [vmem:[%s797_s21 + $0x30] sm:$0xff]  ;;  %v228_v11 = vsel %vm221_vm0, %v811_v9, 0.0  ;;  %v821_v13 = vld [vmem:[%s797_s21 + $0x28] sm:$0xff]  ;;  %v255_v14 = vsel %vm221_vm0, %v818_v12, 0.0  ;;  %v831_v17 = vld [vmem:[%s797_s21 + $0x40] sm:$0xff] }
  0x13   : > { %v231_v10 = vsel %vm221_vm0, %v808_v8, 0.0  ;;  %v252_v15 = vsel %vm221_vm0, %v821_v13, 0.0  ;;  %v828_v16 = vld [vmem:[%s797_s21 + $0x50] sm:$0xff]  ;;  %v234_v19 = vsel %vm221_vm0, %v831_v17, 0.0  ;;  %v838_v20 = vld [vmem:[%s797_s21 + $0x58] sm:$0xff]  ;;  %v841_v21 = vld [vmem:[%s797_s21 + $0x48] sm:$0xff] }
  0x14   : > { %v237_v18 = vsel %vm221_vm0, %v828_v16, 0.0  ;;  %v261_v22 = vsel %vm221_vm0, %v838_v20, 0.0  ;;  %v258_v23 = vsel %vm221_vm0, %v841_v21, 0.0  ;;  %v848_v24 = vld [vmem:[%s797_s21 + $0x70] sm:$0xff]  ;;  %v851_v25 = vld [vmem:[%s797_s21 + $0x60] sm:$0xff]  ;;  %v858_v28 = vld [vmem:[%s797_s21 + $0x78] sm:$0xff] }
  0x15   : > { %v243_v26 = vsel %vm221_vm0, %v848_v24, 0.0  ;;  %v240_v27 = vsel %vm221_vm0, %v851_v25, 0.0  ;;  %v861_v29 = vld [vmem:[%s797_s21 + $0x68] sm:$0xff]  ;;  %v267_v30 = vsel %vm221_vm0, %v858_v28, 0.0 }
  0x16   : > { %250 = vadd.xlane.f32.xlu1 %v249_v6  ;;  %226 = vadd.xlane.f32.xlu0 %v225_v7  ;;  %v264_v31 = vsel %vm221_vm0, %v861_v29, 0.0 }
  0x1a   : > { %232 = vadd.xlane.f32.xlu1 %v231_v10  ;;  %229 = vadd.xlane.f32.xlu0 %v228_v11 }
  0x1e   : > { %256 = vadd.xlane.f32.xlu1 %v255_v14  ;;  %253 = vadd.xlane.f32.xlu0 %v252_v15 }
  0x22   : > { %238 = vadd.xlane.f32.xlu1 %v237_v18  ;;  %235 = vadd.xlane.f32.xlu0 %v234_v19 }
  0x26   : > { %262 = vadd.xlane.f32.xlu1 %v261_v22  ;;  %259 = vadd.xlane.f32.xlu0 %v258_v23 }
  0x2a   : > { %244 = vadd.xlane.f32.xlu1 %v243_v26  ;;  %241 = vadd.xlane.f32.xlu0 %v240_v27 }
  0x2e   : > { %268 = vadd.xlane.f32.xlu1 %v267_v30  ;;  %265 = vadd.xlane.f32.xlu0 %v264_v31 }
  0x9f   : > { %v248_v32 = vpop.xlane.xlu1 %247  ;;  %v224_v33 = vpop.xlane.xlu0 %223 }
  0xa0   : > { %v270_v34 = vadd.f32 %v248_v32, %v224_v33 }
  0xa2   : > { %v278_v35 = vmul.f32 0.0625, %v270_v34 }
  0xa3   : > { %v251_v36 = vpop.xlane.xlu1 %250  ;;  %v227_v37 = vpop.xlane.xlu0 %226 }
  0xa4   : > { %v867_v38 = vsub.f32 %v205_v1, %v278_v35  ;;  %v869_v39 = vsub.f32 %v206_v0, %v278_v35  ;;  %v271_v40 = vadd.f32 %v251_v36, %v227_v37 }
  0xa6   : > { %v279_v41 = vmul.f32 0.0625, %v271_v40  ;;  %v302_v42 = vmul.f32 %v867_v38, %v867_v38  ;;  %v334_v48 = vmul.f32 %v869_v39, %v869_v39 }
  0xa7   : > { %v233_v43 = vpop.xlane.xlu1 %232  ;;  %v230_v44 = vpop.xlane.xlu0 %229 }
  0xa8   : > { %v873_v45 = vsub.f32 %v207_v5, %v279_v41  ;;  %v875_v46 = vsub.f32 %v208_v2, %v279_v41  ;;  %v310_v47 = vsel %vm221_vm0, %v302_v42, 0.0  ;;  %v342_v55 = vsel %vm221_vm0, %v334_v48, 0.0 }
  0xa9   : > { %311 = vadd.xlane.f32.xlu0 %v310_v47 }
  0xaa   : > { %v303_v49 = vmul.f32 %v873_v45, %v873_v45  ;;  %v335_v52 = vmul.f32 %v875_v46, %v875_v46 }
  0xab   : > { %v257_v50 = vpop.xlane.xlu1 %256  ;;  %v254_v51 = vpop.xlane.xlu0 %253 }
  0xac   : > { %v273_v53 = vadd.f32 %v257_v50, %v233_v43  ;;  %v272_v54 = vadd.f32 %v254_v51, %v230_v44  ;;  %v313_v56 = vsel %vm221_vm0, %v303_v49, 0.0  ;;  %v345_v61 = vsel %vm221_vm0, %v335_v52, 0.0  ;;  %v423_v52 = vld [vmem:[%s1019_s2] sm:$0xf] }
  0xad   : > { %343 = vadd.xlane.f32.xlu0 %v342_v55  ;;  %314 = vadd.xlane.f32.xlu1 %v313_v56 }
  0xae   : > { %v281_v57 = vmul.f32 0.0625, %v273_v53  ;;  %v280_v58 = vmul.f32 0.0625, %v272_v54  ;;  %v422_v53 = vld [vmem:[%s1018_s1] sm:$0xf]  ;;  %724 = vmatprep.subr.msk.bf16.mxu1 %vm436_vm1, %v423_v52  ;;  %v438_v54 = vsel %vm436_vm1, %v423_v52, 0 }
  0xaf   : > { %v239_v59 = vpop.xlane.xlu1 %238  ;;  %v236_v60 = vpop.xlane.xlu0 %235  ;;  %725 = vmatprep.subr.msk.bf16.mxu0 %vm436_vm1, %v422_v53  ;;  %v518_v55 = vsel %vm436_vm1, %v422_v53, 0  ;;  %697 = vmatpush3.bf16.msra.mxu1 %v438_v54 }
  0xb0   : > { %v888_v62 = vsub.f32 %v808_v8, %v281_v57  ;;  %v891_v63 = vsub.f32 %v818_v12, %v281_v57  ;;  %v894_v0 = vsub.f32 %v811_v9, %v280_v58  ;;  %v897_v1 = vsub.f32 %v821_v13, %v280_v58  ;;  %707 = vmatpush3.bf16.msra.mxu0 %v518_v55 }
  0xb1   : > { %346 = vadd.xlane.f32.xlu1 %v345_v61 }
  0xb2   : > { %v305_v2 = vmul.f32 %v888_v62, %v888_v62  ;;  %v304_v3 = vmul.f32 %v894_v0, %v894_v0  ;;  %v337_v6 = vmul.f32 %v891_v63, %v891_v63  ;;  %v336_v7 = vmul.f32 %v897_v1, %v897_v1 }
  0xb3   : > { %v263_v4 = vpop.xlane.xlu1 %262  ;;  %v260_v5 = vpop.xlane.xlu0 %259 }
  0xb4   : > { %v275_v8 = vadd.f32 %v263_v4, %v239_v59  ;;  %v274_v9 = vadd.f32 %v260_v5, %v236_v60  ;;  %v319_v10 = vsel %vm221_vm0, %v305_v2, 0.0  ;;  %v316_v11 = vsel %vm221_vm0, %v304_v3, 0.0 }
  0xb5   : > { %320 = vadd.xlane.f32.xlu1 %v319_v10  ;;  %317 = vadd.xlane.f32.xlu0 %v316_v11  ;;  %v351_v18 = vsel %vm221_vm0, %v337_v6, 0.0  ;;  %v348_v19 = vsel %vm221_vm0, %v336_v7, 0.0 }
  0xb6   : > { %v283_v12 = vmul.f32 0.0625, %v275_v8  ;;  %v282_v13 = vmul.f32 0.0625, %v274_v9 }
  0xb7   : > { %v245_v14 = vpop.xlane.xlu1 %244  ;;  %v242_v15 = vpop.xlane.xlu0 %241 }
  0xb8   : > { %v912_v22 = vsub.f32 %v828_v16, %v283_v12  ;;  %v915_v23 = vsub.f32 %v838_v20, %v283_v12  ;;  %v918_v26 = vsub.f32 %v831_v17, %v282_v13  ;;  %v921_v27 = vsub.f32 %v841_v21, %v282_v13 }
  0xb9   : > { %352 = vadd.xlane.f32.xlu1 %v351_v18  ;;  %349 = vadd.xlane.f32.xlu0 %v348_v19 }
  0xba   : > { %v307_v30 = vmul.f32 %v912_v22, %v912_v22  ;;  %v306_v31 = vmul.f32 %v918_v26, %v918_v26  ;;  %v339_v20 = vmul.f32 %v915_v23, %v915_v23  ;;  %v338_v17 = vmul.f32 %v921_v27, %v921_v27 }
  0xbb   : > { %v269_v32 = vpop.xlane.xlu1 %268  ;;  %v266_v16 = vpop.xlane.xlu0 %265 }
  0xbc   : > { %v277_v33 = vadd.f32 %v269_v32, %v245_v14  ;;  %v276_v34 = vadd.f32 %v266_v16, %v242_v15  ;;  %v325_v21 = vsel %vm221_vm0, %v307_v30, 0.0  ;;  %v322_v35 = vsel %vm221_vm0, %v306_v31, 0.0 }
  0xbd   : > { %326 = vadd.xlane.f32.xlu1 %v325_v21  ;;  %323 = vadd.xlane.f32.xlu0 %v322_v35  ;;  %v357_v40 = vsel %vm221_vm0, %v339_v20, 0.0  ;;  %v354_v41 = vsel %vm221_vm0, %v338_v17, 0.0 }
  0xbe   : > { %v285_v36 = vmul.f32 0.0625, %v277_v33  ;;  %v284_v37 = vmul.f32 0.0625, %v276_v34 }
  0xc0   : > { %v936_v42 = vsub.f32 %v848_v24, %v285_v36  ;;  %v939_v43 = vsub.f32 %v858_v28, %v285_v36  ;;  %v942_v44 = vsub.f32 %v851_v25, %v284_v37  ;;  %v945_v47 = vsub.f32 %v861_v29, %v284_v37 }
  0xc1   : > { %358 = vadd.xlane.f32.xlu1 %v357_v40  ;;  %355 = vadd.xlane.f32.xlu0 %v354_v41 }
  0xc2   : > { %v309_v48 = vmul.f32 %v936_v42, %v936_v42  ;;  %v308_v49 = vmul.f32 %v942_v44, %v942_v44  ;;  %v341_v28 = vmul.f32 %v939_v43, %v939_v43  ;;  %v340_v25 = vmul.f32 %v945_v47, %v945_v47 }
  0xc4   : > { %v331_v24 = vsel %vm221_vm0, %v309_v48, 0.0  ;;  %v328_v50 = vsel %vm221_vm0, %v308_v49, 0.0  ;;  %v363_v29 = vsel %vm221_vm0, %v341_v28, 0.0  ;;  %v360_v51 = vsel %vm221_vm0, %v340_v25, 0.0 }
  0xc5   : > { %332 = vadd.xlane.f32.xlu1 %v331_v24  ;;  %329 = vadd.xlane.f32.xlu0 %v328_v50 }
  0xc9   : > { %364 = vadd.xlane.f32.xlu1 %v363_v29  ;;  %361 = vadd.xlane.f32.xlu0 %v360_v51 }
 0x136   : > { %v312_v56 = vpop.xlane.xlu0 %311 }
 0x13a   : > { %v315_v57 = vpop.xlane.xlu1 %314  ;;  %v344_v58 = vpop.xlane.xlu0 %343 }
 0x13b   : > { %v366_v59 = vadd.f32 %v344_v58, %v312_v56 }
 0x13d   : > { %v374_v60 = vmul.f32 0.0625, %v366_v59 }
 0x13e   : > { %v347_v61 = vpop.xlane.xlu1 %346 }
 0x13f   : > { %v382_v2 = vadd.f32 1e-05, %v374_v60  ;;  %v367_v3 = vadd.f32 %v347_v61, %v315_v57 }
 0x141   : > { %v375_v4 = vmul.f32 0.0625, %v367_v3  ;;  %734 = vrsqrt.f32 %v382_v2 }
 0x142   : > { %v321_v5 = vpop.xlane.xlu1 %320  ;;  %v318_v6 = vpop.xlane.xlu0 %317 }
 0x143   : > { %v383_v7 = vadd.f32 1e-05, %v375_v4 }
 0x145   : > { %736 = vrsqrt.f32 %v383_v7 }
 0x146   : > { %v353_v8 = vpop.xlane.xlu1 %352  ;;  %v350_v9 = vpop.xlane.xlu0 %349 }
 0x147   : > { %v369_v10 = vadd.f32 %v353_v8, %v321_v5  ;;  %v368_v11 = vadd.f32 %v350_v9, %v318_v6 }
 0x149   : > { %v377_v12 = vmul.f32 0.0625, %v369_v10  ;;  %v376_v13 = vmul.f32 0.0625, %v368_v11  ;;  %v682_v10 = vld [vmem:[%s1020_s3] ss:$0 sm:$0xff] }
 0x14a   : > { %v327_v14 = vpop.xlane.xlu1 %326  ;;  %v324_v15 = vpop.xlane.xlu0 %323 }
 0x14b   : > { %v385_v18 = vadd.f32 1e-05, %v377_v12  ;;  %v384_v19 = vadd.f32 1e-05, %v376_v13  ;;  %v735_v30 = vpop.eup %734 }
 0x14c   : > { %v410_v33 = vmul.f32 %v735_v30, %v869_v39  ;;  %v398_v21 = vmul.f32 %v735_v30, %v867_v38 }
 0x14d   : > { %738 = vrsqrt.f32 %v385_v18 }
 0x14e   : > { %740 = vrsqrt.f32 %v384_v19  ;;  %v359_v31 = vpop.xlane.xlu1 %358  ;;  %v356_v32 = vpop.xlane.xlu0 %355 }
 0x14f   : > { %v737_v16 = vpop.eup %736  ;;  %v371_v20 = vadd.f32 %v359_v31, %v327_v14  ;;  %v370_v17 = vadd.f32 %v356_v32, %v324_v15 }
 0x150   : > { %v411_v34 = vmul.f32 %v737_v16, %v875_v46  ;;  %v399_v35 = vmul.f32 %v737_v16, %v873_v45 }
 0x151   : > { %v379_v36 = vmul.f32 0.0625, %v371_v20  ;;  %v378_v37 = vmul.f32 0.0625, %v370_v17 }
 0x152   : > { %v333_v40 = vpop.xlane.xlu1 %332  ;;  %v330_v41 = vpop.xlane.xlu0 %329  ;;  %v418_v48 = vpack.c.bf16 %v411_v34, %v410_v33  ;;  %v406_v49 = vpack.c.bf16 %v399_v35, %v398_v21 }
 0x153   : > { %v387_v24 = vadd.f32 1e-05, %v379_v36  ;;  %v386_v50 = vadd.f32 1e-05, %v378_v37 }
 0x154   : > { %698 = vmatprep.mubr.msk.bf16.mxu1 %vm221_vm0, %v418_v48  ;;  %708 = vmatprep.mubr.msk.bf16.mxu0 %vm221_vm0, %v406_v49 }
 0x155   : > { %742 = vrsqrt.f32 %v387_v24 }
 0x156   : > { %744 = vrsqrt.f32 %v386_v50  ;;  %v365_v39 = vpop.xlane.xlu1 %364  ;;  %v362_v46 = vpop.xlane.xlu0 %361 }
 0x157   : > { %v739_v28 = vpop.eup %738  ;;  %v373_v38 = vadd.f32 %v365_v39, %v333_v40  ;;  %v372_v25 = vadd.f32 %v362_v46, %v330_v41 }
 0x158   : > { %v741_v45 = vpop.eup %740  ;;  %v413_v29 = vmul.f32 %v739_v28, %v891_v63  ;;  %v401_v51 = vmul.f32 %v739_v28, %v888_v62 }
 0x159   : > { %v381_v52 = vmul.f32 0.0625, %v373_v38  ;;  %v380_v53 = vmul.f32 0.0625, %v372_v25  ;;  %v412_v54 = vmul.f32 %v741_v45, %v897_v1  ;;  %v400_v55 = vmul.f32 %v741_v45, %v894_v0 }
 0x15b   : > { %v389_v56 = vadd.f32 1e-05, %v381_v52  ;;  %v388_v57 = vadd.f32 1e-05, %v380_v53  ;;  %v419_v58 = vpack.c.bf16 %v413_v29, %v412_v54  ;;  %v407_v59 = vpack.c.bf16 %v401_v51, %v400_v55 }
 0x15d   : > { %746 = vrsqrt.f32 %v389_v56  ;;  %699 = vmatmul.mubr.msk.bf16.vlgmr.msra.gmra.mrb[0].mxu1 %vm221_vm0, %v419_v58  ;;  %709 = vmatmul.mubr.msk.bf16.vlgmr.msra.gmra.mrb[0].mxu0 %vm221_vm0, %v407_v59 }
 0x15e   : > { %748 = vrsqrt.f32 %v388_v57 }
 0x15f   : > { %v743_v60 = vpop.eup %742 }
 0x160   : > { %v745_v63 = vpop.eup %744  ;;  %v415_v62 = vmul.f32 %v743_v60, %v915_v23  ;;  %v403_v61 = vmul.f32 %v743_v60, %v912_v22 }
 0x161   : > { %v414_v1 = vmul.f32 %v745_v63, %v921_v27  ;;  %v402_v0 = vmul.f32 %v745_v63, %v918_v26 }
 0x163   : > { %v420_v2 = vpack.c.bf16 %v415_v62, %v414_v1  ;;  %v408_v3 = vpack.c.bf16 %v403_v61, %v402_v0 }
 0x165   : > { %702 = vmatprep.mubr.msk.bf16.mxu1 %vm221_vm0, %v420_v2  ;;  %712 = vmatprep.mubr.msk.bf16.mxu0 %vm221_vm0, %v408_v3 }
 0x167   : > { %v747_v4 = vpop.eup %746 }
 0x168   : > { %v749_v5 = vpop.eup %748  ;;  %v417_v6 = vmul.f32 %v747_v4, %v939_v43  ;;  %v405_v7 = vmul.f32 %v747_v4, %v936_v42 }
 0x169   : > { %v416_v23 = vmul.f32 %v749_v5, %v945_v47  ;;  %v404_v22 = vmul.f32 %v749_v5, %v942_v44 }
 0x16b   : > { %v421_v27 = vpack.c.bf16 %v417_v6, %v416_v23  ;;  %v409_v8 = vpack.c.bf16 %v405_v7, %v404_v22 }
 0x16d   : > { %703 = vmatmul.mubr.msk.bf16.gmra.mrb[4].mxu1 %vm221_vm0, %v421_v27  ;;  %713 = vmatmul.mubr.msk.bf16.gmra.mrb[4].mxu0 %vm221_vm0, %v409_v8 }
 0x230   : > { %v700_v26 = vpop.f32.mrb[0].mxu1  ;;  %v710_v9 = vpop.f32.mrb[0].mxu0 }
 0x231   : > { %v563_v43 = vadd.f32 %v710_v9, %v700_v26  ;;  %v474_v11 = vpop.f32.mrb[1].mxu1  ;;  %v554_v42 = vpop.f32.mrb[1].mxu0 }
 0x232   : > { %v555_v44 = vadd.f32 %v554_v42, %v474_v11  ;;  %v701_v47 = vpop.f32.mrb[2].mxu1  ;;  %v711_v12 = vpop.f32.mrb[2].mxu0 }
 0x233   : > { %v594_v13 = vadd.f32 %v682_v10, %v563_v43  ;;  %v566_v14 = vadd.f32 %v711_v12, %v701_v47  ;;  %v477_v15 = vpop.f32.mrb[3].mxu1  ;;  %v557_v18 = vpop.f32.mrb[3].mxu0 }
 0x234   : > { %v592_v19 = vadd.f32 %v682_v10, %v555_v44  ;;  %v558_v30 = vadd.f32 %v557_v18, %v477_v15 }
 0x235   : > { %602 = vst.msk [vmem:[%s996_s5 + $0x10] sm:$0xff] %vm221_vm0, %v594_v13  ;;  %v595_v31 = vadd.f32 %v682_v10, %v566_v14 }
 0x236   : > { %600 = vst.msk [vmem:[%s996_s5] sm:$0xff] %vm221_vm0, %v592_v19  ;;  %v593_v32 = vadd.f32 %v682_v10, %v558_v30 }
 0x237   : > { %603 = vst.msk [vmem:[%s996_s5 + $0x18] sm:$0xff] %vm221_vm0, %v595_v31 }
 0x238   : > { %601 = vst.msk [vmem:[%s996_s5 + $0x8] sm:$0xff] %vm221_vm0, %v593_v32 }
 0x240   : > { %v704_v16 = vpop.f32.mrb[4].mxu1  ;;  %v714_v20 = vpop.f32.mrb[4].mxu0 }
 0x241   : > { %v579_v17 = vadd.f32 %v714_v20, %v704_v16  ;;  %v490_v33 = vpop.f32.mrb[5].mxu1  ;;  %v570_v34 = vpop.f32.mrb[5].mxu0 }
 0x242   : > { %v571_v21 = vadd.f32 %v570_v34, %v490_v33  ;;  %v705_v35 = vpop.f32.mrb[6].mxu1  ;;  %v715_v36 = vpop.f32.mrb[6].mxu0 }
 0x243   : > { %v598_v37 = vadd.f32 %v682_v10, %v579_v17  ;;  %v582_v40 = vadd.f32 %v715_v36, %v705_v35  ;;  %v493_v41 = vpop.f32.mrb[7].mxu1  ;;  %v573_v48 = vpop.f32.mrb[7].mxu0 }
 0x244   : > { %v596_v49 = vadd.f32 %v682_v10, %v571_v21  ;;  %v574_v24 = vadd.f32 %v573_v48, %v493_v41 }
 0x245   : > { %606 = vst.msk [vmem:[%s996_s5 + $0x30] sm:$0xff] %vm221_vm0, %v598_v37  ;;  %v599_v50 = vadd.f32 %v682_v10, %v582_v40 }
 0x246   : > { %604 = vst.msk [vmem:[%s996_s5 + $0x20] sm:$0xff] %vm221_vm0, %v596_v49  ;;  %v597_v39 = vadd.f32 %v682_v10, %v574_v24 }
 0x247   : > { %607 = vst.msk [vmem:[%s996_s5 + $0x38] sm:$0xff] %vm221_vm0, %v599_v50 }
 0x248   : > { %605 = vst.msk [vmem:[%s996_s5 + $0x28] sm:$0xff] %vm221_vm0, %v597_v39 }
 0x249 PF: > { %s14_s15 = sadd.s32 1, %s756_s15  }
 0x24a   : > { %p11_p4 = scmp.ge.s32.totalorder %s14_s15, 4  }
 0x24c   :  { %13 = sbr.rel (!%p11_p4) target bundleno = 1 (0x1), region = 66 }

</bundles_post_ra>
